<compile_context>
chip_gen: v6e
topology: v6e:2x2x1
jax: 0.10.0
libtpu: 0.0.40
codegen_flags: <defaults>
</compile_context>

<pallas_src>
import functools
import math

import jax
import jax.numpy as jnp
from jax.experimental import pallas as pl
from jax.experimental.pallas import tpu as pltpu


def _round_up(x: int, m: int) -> int:
    return (x + m - 1) // m * m


def _pinn_fused_kernel(x_ref, w_ref, b_ref, o_ref, *, n_layers: int, compute_dtype):
    # x_ref:  [TB, Dpad]           (batch tile, lane-dense)
    # w_ref:  [L,  Dpad, Dpad]     (all layer weights, zero-padded, x @ W layout)
    # b_ref:  [Lpad, Dpad]         (all biases, zero-padded)
    # o_ref:  [TB, Dpad]
    h = x_ref[...].astype(jnp.float32)
    for i in range(n_layers):                      # static unroll over layers
        w = w_ref[i].astype(compute_dtype)         # [Dpad, Dpad], one layer's weights
        b = b_ref[pl.ds(i, 1), :]                  # [1, Dpad] f32 bias row
        y = jnp.dot(h.astype(compute_dtype), w,
                    preferred_element_type=jnp.float32)
        y = y + b
        if i < n_layers - 1:
            y = jnp.tanh(y)                        # f32 tanh on EUP (free slot)
        h = y
    o_ref[...] = h.astype(o_ref.dtype)


def pinn_forward(params, x, *, tb_max: int = 512, compute_dtype=jnp.float32):
    """Fused Pallas forward pass identical to the PyTorch PINN.

    params: list of (W, b) with W stored as [in, out] (transposed vs nn.Linear).
    x:      [B, Din] float32.
    """
    B, Din = x.shape
    L = len(params)
    dims = [params[0][0].shape[0]] + [w.shape[1] for (w, _) in params]
    assert dims[0] == Din
    d_out = dims[-1]

    # Pad every feature dim up to a common lane-dense width.
    d_pad = max(_round_up(d, 128) for d in dims)
    l_pad = _round_up(L, 8)  # keep the bias stack (8,128)-aligned

    w_stack = jnp.zeros((L, d_pad, d_pad), jnp.float32)
    b_stack = jnp.zeros((l_pad, d_pad), jnp.float32)
    for i, (w, b) in enumerate(params):
        w_stack = w_stack.at[i, : w.shape[0], : w.shape[1]].set(w.astype(jnp.float32))
        b_stack = b_stack.at[i, : b.shape[0]].set(b.astype(jnp.float32))

    # Batch tiling: big enough to amortize per-step overhead, padded to the tile.
    tb = min(tb_max, _round_up(B, 8))
    b_padded = _round_up(B, tb)
    x_pad = jnp.zeros((b_padded, d_pad), x.dtype).at[:B, :Din].set(x)

    grid = (b_padded // tb,)
    kernel = functools.partial(
        _pinn_fused_kernel, n_layers=L, compute_dtype=compute_dtype
    )

    out = pl.pallas_call(
        kernel,
        out_shape=jax.ShapeDtypeStruct((b_padded, d_pad), x.dtype),
        grid_spec=pltpu.PrefetchScalarGridSpec(
            num_scalar_prefetch=0,
            grid=grid,
            in_specs=[
                pl.BlockSpec((tb, d_pad), lambda i: (i, 0)),          # x tile
                pl.BlockSpec((L, d_pad, d_pad), lambda i: (0, 0, 0)),  # weights (resident)
                pl.BlockSpec((l_pad, d_pad), lambda i: (0, 0)),        # biases (resident)
            ],
            out_specs=pl.BlockSpec((tb, d_pad), lambda i: (i, 0)),
        ),
        compiler_params=pltpu.CompilerParams(
            dimension_semantics=("parallel",),       # shard batch across TCs on v7x
            vmem_limit_bytes=32 * 1024 * 1024,        # explicit; safe on v5e/v6e/v7x
        ),
    )(x_pad, w_stack, b_stack)

    return out[:B, :d_out]


def init_pinn_params(layers, key):
    """Deterministic init mimicking nn.Linear default (U[-1/sqrt(fan_in), ..])."""
    params = []
    for i in range(len(layers) - 1):
        fan_in, fan_out = layers[i], layers[i + 1]
        key, kw, kb = jax.random.split(key, 3)
        bound = 1.0 / math.sqrt(fan_in)
        w = jax.random.uniform(kw, (fan_in, fan_out), jnp.float32, -bound, bound)
        b = jax.random.uniform(kb, (fan_out,), jnp.float32, -bound, bound)
        params.append((w, b))
    return params


def pinn_forward_ref(params, x):
    """Pure-JAX reference for verification."""
    n = len(params)
    for i, (w, b) in enumerate(params):
        x = x @ w + b
        if i < n - 1:
            x = jnp.tanh(x)
    return x


if __name__ == "__main__":
    # Typical PINN layer spec: 2 inputs (x, t), hidden layers, 1 output.
    layers = [2, 32, 32, 32, 1]

    key = jax.random.PRNGKey(0)
    key, kx = jax.random.split(key)
    params = init_pinn_params(layers, key)

    # Small canonical batch.
    batch = 8
    x = jax.random.normal(kx, (batch, layers[0]), dtype=jnp.float32)
    out = jax.block_until_ready(pinn_forward(params, x))
    ref = jax.block_until_ready(pinn_forward_ref(params, x))
    assert out.shape == (batch, layers[-1])
    assert jnp.allclose(out, ref, atol=1e-5, rtol=1e-5), "mismatch vs reference (small batch)"

    # Larger, non-multiple batch exercising the batch grid + padding path.
    key, kx2 = jax.random.split(key)
    batch2 = 1000
    x2 = jax.random.normal(kx2, (batch2, layers[0]), dtype=jnp.float32)
    out2 = jax.block_until_ready(pinn_forward(params, x2, tb_max=256))
    ref2 = jax.block_until_ready(pinn_forward_ref(params, x2))
    assert out2.shape == (batch2, layers[-1])
    assert jnp.allclose(out2, ref2, atol=1e-5, rtol=1e-5), "mismatch vs reference (grid batch)"

    print("KERNEL_OK")
</pallas_src>

<mosaic_0001>
module attributes {stable_mosaic.version = 11 : i64} {
  func.func @_pinn_fused_kernel(%arg0: i32, %arg1: memref<8x128xf32, #tpu.memory_space<vmem>>, %arg2: memref<4x128x128xf32, #tpu.memory_space<vmem>>, %arg3: memref<8x128xf32, #tpu.memory_space<vmem>>, %arg4: memref<8x128xf32, #tpu.memory_space<vmem>>) attributes {dimension_semantics = [#tpu.dimension_semantics<parallel>], iteration_bounds = array<i64: 1>, scalar_prefetch = 0 : i64, scratch_operands = 0 : i64, tpu.core_type = #tpu.core_type<tc>, window_params = [{transform_indices = @transform_0, window_bounds = array<i64: 8, 128>}, {pipeline_mode = #tpu.pipeline_mode<synchronous>, transform_indices = @transform_1, window_bounds = array<i64: 4, 128, 128>}, {pipeline_mode = #tpu.pipeline_mode<synchronous>, transform_indices = @transform_2, window_bounds = array<i64: 8, 128>}, {transform_indices = @transform_3, window_bounds = array<i64: 8, 128>}]} {
    %c0 = arith.constant 0 : index
    %c0_0 = arith.constant 0 : index
    %0 = vector.load %arg1[%c0, %c0_0] : memref<8x128xf32, #tpu.memory_space<vmem>>, vector<8x128xf32>
    %c0_1 = arith.constant 0 : index
    %c0_2 = arith.constant 0 : index
    %c0_3 = arith.constant 0 : index
    %1 = vector.load %arg2[%c0_1, %c0_2, %c0_3] : memref<4x128x128xf32, #tpu.memory_space<vmem>>, vector<1x128x128xf32>
    %2 = vector.shape_cast %1 : vector<1x128x128xf32> to vector<128x128xf32>
    %c0_4 = arith.constant 0 : index
    %c0_5 = arith.constant 0 : index
    %3 = vector.load %arg3[%c0_4, %c0_5] : memref<8x128xf32, #tpu.memory_space<vmem>>, vector<1x128xf32>
    %cst = arith.constant dense<0.000000e+00> : vector<8x128xf32>
    %4 = tpu.matmul %0, %2, %cst {dimension_numbers = #tpu.dot_dimension_numbers<[1], [0], [0], [1], [0, 0, 1, 1], [], []>} : vector<8x128xf32>, vector<128x128xf32>, vector<8x128xf32> -> vector<8x128xf32>
    %5 = vector.broadcast %3 : vector<1x128xf32> to vector<8x128xf32>
    %6 = arith.addf %4, %5 : vector<8x128xf32>
    %7 = math.tanh %6 : vector<8x128xf32>
    %c1 = arith.constant 1 : index
    %c0_6 = arith.constant 0 : index
    %c0_7 = arith.constant 0 : index
    %8 = vector.load %arg2[%c1, %c0_6, %c0_7] : memref<4x128x128xf32, #tpu.memory_space<vmem>>, vector<1x128x128xf32>
    %9 = vector.shape_cast %8 : vector<1x128x128xf32> to vector<128x128xf32>
    %c1_8 = arith.constant 1 : index
    %c0_9 = arith.constant 0 : index
    %10 = vector.load %arg3[%c1_8, %c0_9] : memref<8x128xf32, #tpu.memory_space<vmem>>, vector<1x128xf32>
    %cst_10 = arith.constant dense<0.000000e+00> : vector<8x128xf32>
    %11 = tpu.matmul %7, %9, %cst_10 {dimension_numbers = #tpu.dot_dimension_numbers<[1], [0], [0], [1], [0, 0, 1, 1], [], []>} : vector<8x128xf32>, vector<128x128xf32>, vector<8x128xf32> -> vector<8x128xf32>
    %12 = vector.broadcast %10 : vector<1x128xf32> to vector<8x128xf32>
    %13 = arith.addf %11, %12 : vector<8x128xf32>
    %14 = math.tanh %13 : vector<8x128xf32>
    %c2 = arith.constant 2 : index
    %c0_11 = arith.constant 0 : index
    %c0_12 = arith.constant 0 : index
    %15 = vector.load %arg2[%c2, %c0_11, %c0_12] : memref<4x128x128xf32, #tpu.memory_space<vmem>>, vector<1x128x128xf32>
    %16 = vector.shape_cast %15 : vector<1x128x128xf32> to vector<128x128xf32>
    %c2_13 = arith.constant 2 : index
    %c0_14 = arith.constant 0 : index
    %17 = vector.load %arg3[%c2_13, %c0_14] : memref<8x128xf32, #tpu.memory_space<vmem>>, vector<1x128xf32>
    %cst_15 = arith.constant dense<0.000000e+00> : vector<8x128xf32>
    %18 = tpu.matmul %14, %16, %cst_15 {dimension_numbers = #tpu.dot_dimension_numbers<[1], [0], [0], [1], [0, 0, 1, 1], [], []>} : vector<8x128xf32>, vector<128x128xf32>, vector<8x128xf32> -> vector<8x128xf32>
    %19 = vector.broadcast %17 : vector<1x128xf32> to vector<8x128xf32>
    %20 = arith.addf %18, %19 : vector<8x128xf32>
    %21 = math.tanh %20 : vector<8x128xf32>
    %c3 = arith.constant 3 : index
    %c0_16 = arith.constant 0 : index
    %c0_17 = arith.constant 0 : index
    %22 = vector.load %arg2[%c3, %c0_16, %c0_17] : memref<4x128x128xf32, #tpu.memory_space<vmem>>, vector<1x128x128xf32>
    %23 = vector.shape_cast %22 : vector<1x128x128xf32> to vector<128x128xf32>
    %c3_18 = arith.constant 3 : index
    %c0_19 = arith.constant 0 : index
    %24 = vector.load %arg3[%c3_18, %c0_19] : memref<8x128xf32, #tpu.memory_space<vmem>>, vector<1x128xf32>
    %cst_20 = arith.constant dense<0.000000e+00> : vector<8x128xf32>
    %25 = tpu.matmul %21, %23, %cst_20 {dimension_numbers = #tpu.dot_dimension_numbers<[1], [0], [0], [1], [0, 0, 1, 1], [], []>} : vector<8x128xf32>, vector<128x128xf32>, vector<8x128xf32> -> vector<8x128xf32>
    %26 = vector.broadcast %24 : vector<1x128xf32> to vector<8x128xf32>
    %27 = arith.addf %25, %26 : vector<8x128xf32>
    %c0_21 = arith.constant 0 : index
    %c0_22 = arith.constant 0 : index
    %28 = vector.load %arg4[%c0_21, %c0_22] : memref<8x128xf32, #tpu.memory_space<vmem>>, vector<8x128xf32>
    tpu.vector_store %arg4[%c0_21, %c0_22], %27 {strides = array<i32>} : memref<8x128xf32, #tpu.memory_space<vmem>>, vector<8x128xf32>,
    return
  }
  func.func @transform_0(%arg0: i32) -> (i32, i32) {
    %c0_i32 = arith.constant 0 : i32
    %c0_i32_0 = arith.constant 0 : i32
    return %arg0, %c0_i32 : i32, i32
  }
  func.func @transform_1(%arg0: i32) -> (i32, i32, i32) {
    %c0_i32 = arith.constant 0 : i32
    %c0_i32_0 = arith.constant 0 : i32
    %c0_i32_1 = arith.constant 0 : i32
    %c0_i32_2 = arith.constant 0 : i32
    return %c0_i32, %c0_i32_0, %c0_i32_1 : i32, i32, i32
  }
  func.func @transform_2(%arg0: i32) -> (i32, i32) {
    %c0_i32 = arith.constant 0 : i32
    %c0_i32_0 = arith.constant 0 : i32
    %c0_i32_1 = arith.constant 0 : i32
    return %c0_i32, %c0_i32_0 : i32, i32
  }
  func.func @transform_3(%arg0: i32) -> (i32, i32) {
    %c0_i32 = arith.constant 0 : i32
    %c0_i32_0 = arith.constant 0 : i32
    return %arg0, %c0_i32 : i32, i32
  }
}

</mosaic_0001>

<bundles_post_ra>
// kernel: tpu_custom_call.1
= control target key start
LH: loop header
LB: loop body
LE: loop exit
PB: predicated region body
PF: predicated region fallthrough
CT: control target
= control target key end

     0   :  { %8 = vsyncpa [#allocation3], 0  ;;  %s864_s0 = inlined_call_operand.hbm [shape: f32[8,128], index: 0, kind: input, shape index: {}]   ;;  %s865_s1 = inlined_call_operand.hbm [shape: f32[4,128,128], index: 1, kind: input, shape index: {}]   ;;  %s866_s2 = inlined_call_operand.hbm [shape: f32[8,128], index: 2, kind: input, shape index: {}]   ;;  %s867_s3 = inlined_call_operand.hbm [shape: f32[8,128], index: 3, kind: output, shape index: {}]  }
   0x1   :  { %9 = vsyncpa [#allocation6], 0 }
   0x2   :  { %10 = vsyncpa [#allocation4], 0  ;;  %s752_s12 = smov [#allocation5]  }
   0x3   :  { %s26_s13 = sshll.u32 %s752_s12, 4  ;;  %s27_s13 = int_to_ptr.vmem [resolvable:$true] %s26_s13 }
   0x4   :  { %s674_s14 = scalar_lea.vmem %s27_s13, 8192  ;;  %p679_p1 = scmp.lt.s32.totalorder %s27_s13, %s27_s13 }
   0x5   :  { %p675_p0 = scmp.ne.s32.totalorder %s27_s13, %s674_s14  ;;  %p680_p2 = scmp.lt.s32.totalorder %s674_s14, %s674_s14 }
   0x7   :  { %p681_p3 = por %p680_p2, %p679_p1 }
   0x9   :  { %p682_p4 = pnand %p681_p3, %p675_p0 }
   0xb   :  { %685 = shalt.err (!%p682_p4)
}
   0xc   :  { %s753_s15 = smov 128   ;;  %s754_s16 = smov 8  }
   0xd   :  { %32 = dma.hbm_to_vmem [thread:$0]  %s865_s1, 8192, %s27_s13, [#allocation6], %s753_s15, %s753_s15, %s754_s16  }
   0xe   :  { %s755_s19 = smov [#allocation2]   ;;  %s756_s21 = smov [#allocation7]  }
   0xf   :  { %s17_s20 = sshll.u32 %s755_s19, 4  ;;  %s39_s22 = sshll.u32 %s756_s21, 4  ;;  %s18_s20 = int_to_ptr.vmem [resolvable:$true] %s17_s20  ;;  %s40_s22 = int_to_ptr.vmem [resolvable:$true] %s39_s22 }
  0x10   :  { %s694_s23 = scalar_lea.vmem %s18_s20, 128  ;;  %p699_p6 = scmp.lt.s32.totalorder %s18_s20, %s18_s20 }
  0x11   :  { %p695_p5 = scmp.ne.s32.totalorder %s18_s20, %s694_s23  ;;  %p700_p7 = scmp.lt.s32.totalorder %s694_s23, %s694_s23 }
  0x13   :  { %p701_p8 = por %p700_p7, %p699_p6 }
  0x15   :  { %p702_p9 = pnand %p701_p8, %p695_p5 }
  0x17   :  { %705 = shalt.err (!%p702_p9)
}
  0x18   :  { %20 = dma.hbm_to_vmem [thread:$0]  %s864_s0, 128, %s18_s20, [#allocation3]  }
  0x19   :  { %s714_s26 = scalar_lea.vmem %s40_s22, 128  ;;  %p719_p11 = scmp.lt.s32.totalorder %s40_s22, %s40_s22 }
  0x1a   :  { %p715_p10 = scmp.ne.s32.totalorder %s40_s22, %s714_s26  ;;  %p720_p12 = scmp.lt.s32.totalorder %s714_s26, %s714_s26 }
  0x1c   :  { %p721_p13 = por %p720_p12, %p719_p11 }
  0x1e   :  { %p722_p0 = pnand %p721_p13, %p715_p10 }
  0x20   :  { %725 = shalt.err (!%p722_p0)
}
  0x21   :  { %42 = dma.hbm_to_vmem [thread:$0]  %s866_s2, 128, %s40_s22, [#allocation6]  }
  0x22   :  { %746 = dma.done.wait [#allocation3], 128  }
  0x23   :  { %747 = vsyncadd [#allocation3], 4294967168 }
  0x24   :  { %748 = dma.done.wait [#allocation6], 8320  }
  0x25   :  { %749 = vsyncadd [#allocation6], 4294958976  ;;  %v757_v0 = vmov 0.0   ;;  %vm758_vm0 = vmmov 0   ;;  %v68_v1 = vld [vmem:[#allocation5 + $0x78] sm:$0xff]  ;;  %v67_v2 = vld [vmem:[#allocation5 + $0x70] sm:$0xff] }
  0x26   :  { %512 = vmatprep.subr.mxu0 %v757_v0  ;;  %544 = vmatprep.mubr.msk.f32.mxu0 %vm758_vm0, %v757_v0  ;;  %v66_v3 = vld [vmem:[#allocation5 + $0x68] sm:$0xff]  ;;  %v65_v4 = vld [vmem:[#allocation5 + $0x60] sm:$0xff]  ;;  %v161_v5 = vld [vmem:[#allocation5 + $0xf8] sm:$0xff]  ;;  %s759_s0 = smov [#allocation8]  }
  0x27   :  { %547 = vmatprep.subr.mxu1 %v757_v0  ;;  %579 = vmatprep.mubr.msk.f32.mxu1 %vm758_vm0, %v757_v0  ;;  %v64_v6 = vld [vmem:[#allocation5 + $0x58] sm:$0xff]  ;;  %v160_v7 = vld [vmem:[#allocation5 + $0xf0] sm:$0xff]  ;;  %v159_v8 = vld [vmem:[#allocation5 + $0xe8] sm:$0xff]  ;;  %s430_s2 = sshll.u32 %s759_s0, 4  ;;  %s431_s2 = int_to_ptr.vmem [resolvable:$true] %s430_s2 }
  0x28   :  { %513 = vmatpush3.msra.mxu0 %v68_v1  ;;  %548 = vmatpush3.msra.mxu1 %v161_v5  ;;  %v63_v9 = vld [vmem:[#allocation5 + $0x50] sm:$0xff]  ;;  %v158_v10 = vld [vmem:[#allocation5 + $0xe0] sm:$0xff]  ;;  %v62_v11 = vld [vmem:[#allocation5 + $0x48] sm:$0xff]  ;;  %s726_s28 = scalar_lea.vmem %s431_s2, 128  ;;  %p731_p2 = scmp.lt.s32.totalorder %s431_s2, %s431_s2 }
  0x29   :  { %514 = vmatprep.subr.mxu0 %v757_v0  ;;  %549 = vmatprep.subr.mxu1 %v757_v0  ;;  %v157_v12 = vld [vmem:[#allocation5 + $0xd8] sm:$0xff]  ;;  %v61_v13 = vld [vmem:[#allocation5 + $0x40] sm:$0xff]  ;;  %v156_v14 = vld [vmem:[#allocation5 + $0xd0] sm:$0xff]  ;;  %p727_p1 = scmp.ne.s32.totalorder %s431_s2, %s726_s28  ;;  %p732_p3 = scmp.lt.s32.totalorder %s726_s28, %s726_s28 }
  0x2a   :  { %515 = vmatpush3.msra.mxu0 %v67_v2  ;;  %550 = vmatpush3.msra.mxu1 %v160_v7  ;;  %v60_v15 = vld [vmem:[#allocation5 + $0x38] sm:$0xff]  ;;  %v155_v16 = vld [vmem:[#allocation5 + $0xc8] sm:$0xff]  ;;  %v59_v17 = vld [vmem:[#allocation5 + $0x30] sm:$0xff] }
  0x2b   :  { %516 = vmatprep.subr.mxu0 %v757_v0  ;;  %551 = vmatprep.subr.mxu1 %v757_v0  ;;  %v58_v18 = vld [vmem:[#allocation5 + $0x28] sm:$0xff]  ;;  %v57_v19 = vld [vmem:[#allocation5 + $0x20] sm:$0xff]  ;;  %v56_v20 = vld [vmem:[#allocation5 + $0x18] sm:$0xff]  ;;  %p733_p4 = por %p732_p3, %p731_p2 }
  0x2c   :  { %517 = vmatpush3.msra.mxu0 %v66_v3  ;;  %552 = vmatpush3.msra.mxu1 %v159_v8  ;;  %v55_v21 = vld [vmem:[#allocation5 + $0x10] sm:$0xff]  ;;  %v54_v22 = vld [vmem:[#allocation5 + $0x8] sm:$0xff]  ;;  %v53_v23 = vld [vmem:[#allocation5] sm:$0xff] }
  0x2d   :  { %518 = vmatprep.subr.mxu0 %v757_v0  ;;  %553 = vmatprep.subr.mxu1 %v757_v0  ;;  %v52_v24 = vld [vmem:[#allocation2] sm:$0xff]  ;;  %v154_v25 = vld [vmem:[#allocation5 + $0xc0] sm:$0xff]  ;;  %v152_v27 = vld [vmem:[#allocation5 + $0xb0] sm:$0xff]  ;;  %p734_p5 = pnand %p733_p4, %p727_p1 }
  0x2e   :  { %519 = vmatpush3.msra.mxu0 %v65_v4  ;;  %554 = vmatpush3.msra.mxu1 %v158_v10  ;;  %v153_v26 = vld [vmem:[#allocation5 + $0xb8] sm:$0xff]  ;;  %v151_v28 = vld [vmem:[#allocation5 + $0xa8] sm:$0xff]  ;;  %v150_v29 = vld [vmem:[#allocation5 + $0xa0] sm:$0xff] }
  0x2f   :  { %520 = vmatprep.subr.mxu0 %v757_v0  ;;  %555 = vmatprep.subr.mxu1 %v757_v0  ;;  %v149_v30 = vld [vmem:[#allocation5 + $0x98] sm:$0xff]  ;;  %v148_v31 = vld [vmem:[#allocation5 + $0x90] sm:$0xff]  ;;  %v147_v32 = vld [vmem:[#allocation5 + $0x88] sm:$0xff] }
  0x30   :  { %521 = vmatpush3.msra.mxu0 %v64_v6  ;;  %556 = vmatpush3.msra.mxu1 %v157_v12  ;;  %v146_v33 = vld [vmem:[#allocation5 + $0x80] sm:$0xff]  ;;  %v254_v34 = vld [vmem:[#allocation5 + $0x178] sm:$0xff]  ;;  %v253_v35 = vld [vmem:[#allocation5 + $0x170] sm:$0xff] }
  0x31   :  { %522 = vmatprep.subr.mxu0 %v757_v0  ;;  %557 = vmatprep.subr.mxu1 %v757_v0  ;;  %v252_v36 = vld [vmem:[#allocation5 + $0x168] sm:$0xff]  ;;  %v251_v37 = vld [vmem:[#allocation5 + $0x160] sm:$0xff]  ;;  %v250_v38 = vld [vmem:[#allocation5 + $0x158] sm:$0xff] }
  0x32   :  { %523 = vmatpush3.msra.mxu0 %v63_v9  ;;  %558 = vmatpush3.msra.mxu1 %v156_v14  ;;  %v249_v39 = vld [vmem:[#allocation5 + $0x150] sm:$0xff]  ;;  %v248_v40 = vld [vmem:[#allocation5 + $0x148] sm:$0xff]  ;;  %v440_v41 = vld [vmem:[#allocation7] ss:$0 sm:$0xff] }
  0x33   :  { %524 = vmatprep.subr.mxu0 %v757_v0  ;;  %559 = vmatprep.subr.mxu1 %v757_v0  ;;  %v247_v46 = vld [vmem:[#allocation5 + $0x140] sm:$0xff]  ;;  %v246_v47 = vld [vmem:[#allocation5 + $0x138] sm:$0xff]  ;;  %v245_v48 = vld [vmem:[#allocation5 + $0x130] sm:$0xff] }
  0x34   :  { %525 = vmatpush3.msra.mxu0 %v62_v11  ;;  %560 = vmatpush3.msra.mxu1 %v155_v16  ;;  %v244_v49 = vld [vmem:[#allocation5 + $0x128] sm:$0xff]  ;;  %v243_v50 = vld [vmem:[#allocation5 + $0x120] sm:$0xff]  ;;  %v242_v51 = vld [vmem:[#allocation5 + $0x118] sm:$0xff] }
  0x35   :  { %526 = vmatprep.subr.mxu0 %v757_v0  ;;  %561 = vmatprep.subr.mxu1 %v757_v0  ;;  %v241_v52 = vld [vmem:[#allocation5 + $0x110] sm:$0xff]  ;;  %v240_v53 = vld [vmem:[#allocation5 + $0x108] sm:$0xff]  ;;  %v239_v54 = vld [vmem:[#allocation5 + $0x100] sm:$0xff] }
  0x36   :  { %527 = vmatpush3.msra.mxu0 %v61_v13  ;;  %562 = vmatpush3.msra.mxu1 %v154_v25  ;;  %v347_v55 = vld [vmem:[#allocation5 + $0x1f8] sm:$0xff]  ;;  %v346_v56 = vld [vmem:[#allocation5 + $0x1f0] sm:$0xff]  ;;  %v345_v57 = vld [vmem:[#allocation5 + $0x1e8] sm:$0xff] }
  0x37   :  { %528 = vmatprep.subr.mxu0 %v757_v0  ;;  %563 = vmatprep.subr.mxu1 %v757_v0  ;;  %v344_v58 = vld [vmem:[#allocation5 + $0x1e0] sm:$0xff]  ;;  %v343_v59 = vld [vmem:[#allocation5 + $0x1d8] sm:$0xff]  ;;  %v342_v60 = vld [vmem:[#allocation5 + $0x1d0] sm:$0xff] }
  0x38   :  { %529 = vmatpush3.msra.mxu0 %v60_v15  ;;  %564 = vmatpush3.msra.mxu1 %v153_v26  ;;  %v341_v61 = vld [vmem:[#allocation5 + $0x1c8] sm:$0xff]  ;;  %v441_v62 = vld [vmem:[#allocation7 + $0x1] ss:$0 sm:$0xff]  ;;  %v339_v5 = vld [vmem:[#allocation5 + $0x1b8] sm:$0xff] }
  0x39   :  { %530 = vmatprep.subr.mxu0 %v757_v0  ;;  %565 = vmatprep.subr.mxu1 %v757_v0  ;;  %v340_v4 = vld [vmem:[#allocation5 + $0x1c0] sm:$0xff]  ;;  %v338_v6 = vld [vmem:[#allocation5 + $0x1b0] sm:$0xff]  ;;  %v337_v7 = vld [vmem:[#allocation5 + $0x1a8] sm:$0xff] }
  0x3a   :  { %531 = vmatpush3.msra.mxu0 %v59_v17  ;;  %566 = vmatpush3.msra.mxu1 %v152_v27  ;;  %v336_v8 = vld [vmem:[#allocation5 + $0x1a0] sm:$0xff]  ;;  %v335_v9 = vld [vmem:[#allocation5 + $0x198] sm:$0xff]  ;;  %v334_v10 = vld [vmem:[#allocation5 + $0x190] sm:$0xff] }
  0x3b   :  { %532 = vmatprep.subr.mxu0 %v757_v0  ;;  %567 = vmatprep.subr.mxu1 %v757_v0  ;;  %v333_v11 = vld [vmem:[#allocation5 + $0x188] sm:$0xff]  ;;  %v332_v12 = vld [vmem:[#allocation5 + $0x180] sm:$0xff] }
  0x3c   :  { %533 = vmatpush3.msra.mxu0 %v58_v18  ;;  %568 = vmatpush3.msra.mxu1 %v151_v28  ;;  %v442_v13 = vld [vmem:[#allocation7 + $0x2] ss:$0 sm:$0xff]  ;;  %v443_v18 = vld [vmem:[#allocation7 + $0x3] ss:$0 sm:$0xff] }
  0x3d   :  { %534 = vmatprep.subr.mxu0 %v757_v0  ;;  %569 = vmatprep.subr.mxu1 %v757_v0 }
  0x3e   :  { %535 = vmatpush3.msra.mxu0 %v57_v19  ;;  %570 = vmatpush3.msra.mxu1 %v150_v29 }
  0x3f   :  { %536 = vmatprep.subr.mxu0 %v757_v0  ;;  %571 = vmatprep.subr.mxu1 %v757_v0 }
  0x40   :  { %537 = vmatpush3.msra.mxu0 %v56_v20  ;;  %572 = vmatpush3.msra.mxu1 %v149_v30 }
  0x41   :  { %538 = vmatprep.subr.mxu0 %v757_v0  ;;  %573 = vmatprep.subr.mxu1 %v757_v0 }
  0x42   :  { %539 = vmatpush3.msra.mxu0 %v55_v21  ;;  %574 = vmatpush3.msra.mxu1 %v148_v31 }
  0x43   :  { %540 = vmatprep.subr.mxu0 %v757_v0  ;;  %575 = vmatprep.subr.mxu1 %v757_v0 }
  0x44   :  { %541 = vmatpush3.msra.mxu0 %v54_v22  ;;  %576 = vmatpush3.msra.mxu1 %v147_v32 }
  0x45   :  { %542 = vmatprep.subr.mxu0 %v757_v0  ;;  %577 = vmatprep.subr.mxu1 %v757_v0 }
  0x46   :  { %543 = vmatpush3.msra.mxu0 %v53_v23  ;;  %578 = vmatpush3.msra.mxu1 %v146_v33 }
  0x47   :  { %545 = vmatmul.mubr.f32.vlgmr.msra.gmra.mxu0 %v52_v24  ;;  %582 = vmatprep.subr.mxu0 %v757_v0 }
  0x48   :  { %614 = vmatprep.mubr.msk.f32.mxu0 %vm758_vm0, %v757_v0  ;;  %617 = vmatprep.subr.mxu1 %v757_v0 }
  0x49   :  { %583 = vmatpush3.msra.mxu0 %v254_v34 }
  0x4a   :  { %584 = vmatprep.subr.mxu0 %v757_v0 }
  0x4b   :  { %585 = vmatpush3.msra.mxu0 %v253_v35 }
  0x4c   :  { %586 = vmatprep.subr.mxu0 %v757_v0 }
  0x4d   :  { %587 = vmatpush3.msra.mxu0 %v252_v36 }
  0x4e   :  { %588 = vmatprep.subr.mxu0 %v757_v0 }
  0x4f   :  { %589 = vmatpush3.msra.mxu0 %v251_v37 }
  0x50   :  { %590 = vmatprep.subr.mxu0 %v757_v0 }
  0x51   :  { %591 = vmatpush3.msra.mxu0 %v250_v38 }
  0x52   :  { %592 = vmatprep.subr.mxu0 %v757_v0 }
  0x53   :  { %593 = vmatpush3.msra.mxu0 %v249_v39 }
  0x54   :  { %594 = vmatprep.subr.mxu0 %v757_v0 }
  0x55   :  { %595 = vmatpush3.msra.mxu0 %v248_v40 }
  0x56   :  { %596 = vmatprep.subr.mxu0 %v757_v0 }
  0x57   :  { %597 = vmatpush3.msra.mxu0 %v247_v46 }
  0x58   :  { %598 = vmatprep.subr.mxu0 %v757_v0 }
  0x59   :  { %599 = vmatpush3.msra.mxu0 %v246_v47 }
  0x5a   :  { %600 = vmatprep.subr.mxu0 %v757_v0 }
  0x5b   :  { %601 = vmatpush3.msra.mxu0 %v245_v48 }
  0x5c   :  { %602 = vmatprep.subr.mxu0 %v757_v0 }
  0x5d   :  { %603 = vmatpush3.msra.mxu0 %v244_v49 }
  0x5e   :  { %604 = vmatprep.subr.mxu0 %v757_v0 }
  0x5f   :  { %605 = vmatpush3.msra.mxu0 %v243_v50 }
  0x60   :  { %606 = vmatprep.subr.mxu0 %v757_v0 }
  0x61   :  { %607 = vmatpush3.msra.mxu0 %v242_v51 }
  0x62   :  { %608 = vmatprep.subr.mxu0 %v757_v0 }
  0x63   :  { %609 = vmatpush3.msra.mxu0 %v241_v52 }
  0x64   :  { %610 = vmatprep.subr.mxu0 %v757_v0 }
  0x65   :  { %611 = vmatpush3.msra.mxu0 %v240_v53 }
  0x66   :  { %612 = vmatprep.subr.mxu0 %v757_v0 }
  0x67   :  { %613 = vmatpush3.msra.mxu0 %v239_v54 }
 0x107   :  { %v140_v42 = vpop.f32.mrf.mxu0 }
 0x108   :  { %v141_v43 = vadd.f32 %v440_v41, %v140_v42 }
 0x109   :  { %v546_v44 = vpop.f32.mrf.mxu0 }
 0x10a   :  { %660 = vtanh.f32 %v141_v43 }
 0x117   :  { %v661_v45 = vpop.eup %660 }
 0x118   :  { %580 = vmatmul.mubr.f32.vlgmr.msra.gmra.mxu1 %v661_v45 }
 0x119   :  { %649 = vmatprep.mubr.msk.f32.mxu1 %vm758_vm0, %v757_v0  ;;  %618 = vmatpush3.msra.mxu1 %v347_v55 }
 0x11a   :  { %619 = vmatprep.subr.mxu1 %v757_v0 }
 0x11b   :  { %620 = vmatpush3.msra.mxu1 %v346_v56 }
 0x11c   :  { %621 = vmatprep.subr.mxu1 %v757_v0 }
 0x11d   :  { %622 = vmatpush3.msra.mxu1 %v345_v57 }
 0x11e   :  { %623 = vmatprep.subr.mxu1 %v757_v0 }
 0x11f   :  { %624 = vmatpush3.msra.mxu1 %v344_v58 }
 0x120   :  { %625 = vmatprep.subr.mxu1 %v757_v0 }
 0x121   :  { %626 = vmatpush3.msra.mxu1 %v343_v59 }
 0x122   :  { %627 = vmatprep.subr.mxu1 %v757_v0 }
 0x123   :  { %628 = vmatpush3.msra.mxu1 %v342_v60 }
 0x124   :  { %629 = vmatprep.subr.mxu1 %v757_v0 }
 0x125   :  { %630 = vmatpush3.msra.mxu1 %v341_v61 }
 0x126   :  { %631 = vmatprep.subr.mxu1 %v757_v0 }
 0x127   :  { %632 = vmatpush3.msra.mxu1 %v340_v4 }
 0x128   :  { %633 = vmatprep.subr.mxu1 %v757_v0 }
 0x129   :  { %634 = vmatpush3.msra.mxu1 %v339_v5 }
 0x12a   :  { %635 = vmatprep.subr.mxu1 %v757_v0 }
 0x12b   :  { %636 = vmatpush3.msra.mxu1 %v338_v6 }
 0x12c   :  { %637 = vmatprep.subr.mxu1 %v757_v0 }
 0x12d   :  { %638 = vmatpush3.msra.mxu1 %v337_v7 }
 0x12e   :  { %639 = vmatprep.subr.mxu1 %v757_v0 }
 0x12f   :  { %640 = vmatpush3.msra.mxu1 %v336_v8 }
 0x130   :  { %641 = vmatprep.subr.mxu1 %v757_v0 }
 0x131   :  { %642 = vmatpush3.msra.mxu1 %v335_v9 }
 0x132   :  { %643 = vmatprep.subr.mxu1 %v757_v0 }
 0x133   :  { %644 = vmatpush3.msra.mxu1 %v334_v10 }
 0x134   :  { %645 = vmatprep.subr.mxu1 %v757_v0 }
 0x135   :  { %646 = vmatpush3.msra.mxu1 %v333_v11 }
 0x136   :  { %647 = vmatprep.subr.mxu1 %v757_v0 }
 0x137   :  { %648 = vmatpush3.msra.mxu1 %v332_v12 }
 0x1d8   :  { %v233_v63 = vpop.f32.mrf.mxu1 }
 0x1d9   :  { %v234_v1 = vadd.f32 %v441_v62, %v233_v63 }
 0x1da   :  { %v581_v2 = vpop.f32.mrf.mxu1 }
 0x1db   :  { %662 = vtanh.f32 %v234_v1 }
 0x1e8   :  { %v663_v3 = vpop.eup %662 }
 0x1e9   :  { %615 = vmatmul.mubr.f32.vlgmr.msra.gmra.mxu0 %v663_v3 }
 0x2a9   :  { %v326_v14 = vpop.f32.mrf.mxu0 }
 0x2aa   :  { %v327_v15 = vadd.f32 %v442_v13, %v326_v14 }
 0x2ab   :  { %v616_v16 = vpop.f32.mrf.mxu0 }
 0x2ac   :  { %664 = vtanh.f32 %v327_v15 }
 0x2b9   :  { %v665_v17 = vpop.eup %664 }
 0x2ba   :  { %650 = vmatmul.mubr.f32.vlgmr.msra.gmra.mxu1 %v665_v17 }
 0x37a   :  { %v419_v19 = vpop.f32.mrf.mxu1 }
 0x37b   :  { %v420_v20 = vadd.f32 %v443_v18, %v419_v19 }
 0x37c   :  { %v651_v21 = vpop.f32.mrf.mxu1 }
 0x37d   :  { %423 = vst [vmem:[#allocation8] sm:$0xff] %v420_v20 }
 0x37e   :  { %737 = shalt.err (!%p734_p5)
}
 0x37f   :  { %433 = dma.vmem_to_hbm [thread:$0]  %s431_s2, 128, %s867_s3, [#allocation4]  }
 0x380   :  { %750 = dma.done.wait [#allocation4], 128  }
 0x381   :  { %751 = vsyncadd [#allocation4], 4294967168 }
 0x382   :  { %437 = vsyncpa [#allocation3], 1 }
 0x383   :  { %438 = vsyncpa [#allocation6], 1 }
 0x384   :  { %439 = vsyncpa [#allocation4], 1 }

</bundles_post_ra>
